<compile_context>
chip_gen: v7x
topology: tpu7x:2x2x1
jax: 0.10.0
libtpu: 0.0.40
codegen_flags: <defaults>
</compile_context>

<pallas_src>
import functools

import jax
import jax.numpy as jnp
from jax.experimental import pallas as pl
from jax.experimental.pallas import tpu as pltpu


def _round_up(x: int, m: int) -> int:
    return ((x + m - 1) // m) * m


def _cdiv(a: int, b: int) -> int:
    return (a + b - 1) // b


def _vmem_capacity_bytes() -> int:
    """Per-core VMEM capacity; conservative fallback if the query fails."""
    try:
        cap = int(pltpu.get_tpu_info().vmem_capacity_bytes)
        if cap > 0:
            return cap
    except Exception:
        pass
    return 64 * 1024 * 1024  # v7x per-TC VMEM (safe lower bound everywhere)


def _distill_kl_kernel(ys_ref, yt_ref, out_ref, *, inv_T: float, batch: int,
                       mask_rows: bool):
    # One (tb, C) tile of student / teacher logits; all math in f32.
    ys = ys_ref[...].astype(jnp.float32) * inv_T
    yt = yt_ref[...].astype(jnp.float32) * inv_T
    tb = ys.shape[0]

    if mask_rows:
        # Last batch tile is ragged: zero out-of-range rows.  Identical
        # all-zero student/teacher rows contribute exactly 0 KL, and no
        # NaN/Inf from uninitialized VMEM can enter the reductions.
        row = pl.program_id(0) * tb + jax.lax.broadcasted_iota(
            jnp.int32, (tb, 1), 0)
        valid = row < batch
        ys = jnp.where(valid, ys, 0.0)
        yt = jnp.where(valid, yt, 0.0)

    # Stable per-row shifts.  Class axis equals the full array dim, so Mosaic
    # masks the physical lane padding in these reductions automatically.
    m_s = jnp.max(ys, axis=1, keepdims=True)
    m_t = jnp.max(yt, axis=1, keepdims=True)
    ys_shift = ys - m_s
    yt_shift = yt - m_t

    exp_s = jnp.exp(ys_shift)
    exp_t = jnp.exp(yt_shift)
    z_s = jnp.sum(exp_s, axis=1, keepdims=True)  # >= 1 (contains exp(0))
    z_t = jnp.sum(exp_t, axis=1, keepdims=True)  # >= 1

    # KL(p_t || p_s) per row.
    num = jnp.sum(exp_t * (yt_shift - ys_shift), axis=1, keepdims=True)
    # Exact divide (approx reciprocal was not accurate enough for the loss).
    kl_rows = num / z_t - (jnp.log(z_t) - jnp.log(z_s))

    # Per-tile partial sum, broadcast across 128 lanes for a lane-dense store.
    out_ref[...] = jnp.full((1, 1, 128), jnp.sum(kl_rows), dtype=jnp.float32)


def distill_kl(
    y_s: jax.Array,
    y_t: jax.Array,
    T: float = 4.0,
    *,
    block_b: int = 2048,
) -> jax.Array:
    """Pallas implementation of DistillKL.forward(y_s, y_t)."""
    assert y_s.shape == y_t.shape and y_s.ndim == 2
    B, C = y_s.shape

    # --- VMEM budgeting -----------------------------------------------------
    c_pad = _round_up(max(C, 1), 128)  # physical lane padding inside VMEM
    itemsize = max(jnp.dtype(y_s.dtype).itemsize, jnp.dtype(y_t.dtype).itemsize)

    vmem_cap = _vmem_capacity_bytes()
    # Explicit scoped-VMEM limit with headroom: ~48 MiB on v7x, ~96 MiB v5e/v6e.
    vmem_limit = min((vmem_cap * 3) // 4, 100 * 1024 * 1024)
    # Per batch-row cost: 2 inputs x 2 pipeline buffers in the input dtype,
    # plus ~6 live f32 (tb, C) temporaries (ys/yt, shifts, exp_s, exp_t).
    bytes_per_row = (4 * itemsize + 6 * 4) * c_pad
    max_tb = max(8, (vmem_limit - (1 << 20)) // bytes_per_row)

    # --- Tile selection -----------------------------------------------------
    tb = min(block_b, max_tb, _round_up(B, 8))
    if B > 8:
        # Keep >= 2 grid steps so v7x can shard the "parallel" axis over 2 TCs.
        tb = min(tb, _round_up(_cdiv(B, 2), 8))
    tb = max(8, (tb // 8) * 8)
    num_tiles = _cdiv(B, tb)
    # TODO(synk): class-axis tiling (online logsumexp over a second "arbitrary"
    # grid axis) for vocabularies so large that a single (8, C) row block no
    # longer fits in the VMEM budget.

    kernel = functools.partial(
        _distill_kl_kernel,
        inv_T=1.0 / float(T),
        batch=B,
        mask_rows=(B % tb != 0),
    )

    partials = pl.pallas_call(
        kernel,
        out_shape=jax.ShapeDtypeStruct((num_tiles, 1, 128), jnp.float32),
        grid=(num_tiles,),
        in_specs=[
            pl.BlockSpec((tb, C), lambda i: (i, 0)),
            pl.BlockSpec((tb, C), lambda i: (i, 0)),
        ],
        out_specs=pl.BlockSpec((1, 1, 128), lambda i: (i, 0, 0)),
        compiler_params=pltpu.CompilerParams(
            dimension_semantics=("parallel",),
            vmem_limit_bytes=int(vmem_limit),
        ),
    )(y_s, y_t)

    # Tiny cross-tile reduction + T^2 / B scaling in plain XLA (original B).
    return jnp.sum(partials[:, 0, 0]) * (float(T) * float(T)) / B


def _reference(y_s, y_t, T=4.0):
    # Pure-JAX reference for sanity checking.
    ys = y_s.astype(jnp.float32) / T
    yt = y_t.astype(jnp.float32) / T
    log_p_s = jax.nn.log_softmax(ys, axis=1)
    p_t = jax.nn.softmax(yt, axis=1)
    log_p_t = jax.nn.log_softmax(yt, axis=1)
    return jnp.sum(p_t * (log_p_t - log_p_s)) * (T * T) / y_s.shape[0]


if __name__ == "__main__":
    key = jax.random.PRNGKey(0)
    k1, k2, k3, k4, k5, k6 = jax.random.split(key, 6)

    # Case 1: small (B, C) f32 logits, C not a multiple of 128 (full-dim block).
    B1, C1 = 8, 32
    y_s1 = jax.random.normal(k1, (B1, C1), dtype=jnp.float32)
    y_t1 = jax.random.normal(k2, (B1, C1), dtype=jnp.float32)
    loss1 = distill_kl(y_s1, y_t1, T=4.0)
    jax.block_until_ready(loss1)
    ref1 = _reference(y_s1, y_t1, T=4.0)
    assert jnp.allclose(loss1, ref1, rtol=1e-3, atol=1e-5), (loss1, ref1)

    # Case 2: batch not a multiple of the tile -> multi-step grid + row mask.
    B2, C2 = 18, 40
    y_s2 = jax.random.normal(k3, (B2, C2), dtype=jnp.float32)
    y_t2 = jax.random.normal(k4, (B2, C2), dtype=jnp.float32)
    loss2 = distill_kl(y_s2, y_t2, T=2.0, block_b=8)
    jax.block_until_ready(loss2)
    ref2 = _reference(y_s2, y_t2, T=2.0)
    assert jnp.allclose(loss2, ref2, rtol=1e-3, atol=1e-5), (loss2, ref2)

    # Case 3: bf16 logits in HBM, f32 accumulation inside the kernel,
    #         multi-tile grid via the >=2-steps cap.
    B3, C3 = 16, 256
    y_s3 = jax.random.normal(k5, (B3, C3), dtype=jnp.bfloat16)
    y_t3 = jax.random.normal(k6, (B3, C3), dtype=jnp.bfloat16)
    loss3 = distill_kl(y_s3, y_t3, T=4.0)
    jax.block_until_ready(loss3)
    ref3 = _reference(y_s3, y_t3, T=4.0)
    assert jnp.allclose(loss3, ref3, rtol=1e-3, atol=1e-5), (loss3, ref3)

    print("KERNEL_OK")
</pallas_src>

<mosaic_0001>
module attributes {stable_mosaic.version = 11 : i64} {
  func.func @_distill_kl_kernel(%arg0: i32, %arg1: memref<8x32xf32, #tpu.memory_space<vmem>>, %arg2: memref<8x32xf32, #tpu.memory_space<vmem>>, %arg3: memref<1x1x128xf32, #tpu.memory_space<vmem>>) attributes {dimension_semantics = [#tpu.dimension_semantics<parallel>], iteration_bounds = array<i64: 1>, scalar_prefetch = 0 : i64, scratch_operands = 0 : i64, tpu.core_type = #tpu.core_type<tc>, window_params = [{transform_indices = @transform_0, window_bounds = array<i64: 8, 32>}, {transform_indices = @transform_1, window_bounds = array<i64: 8, 32>}, {transform_indices = @transform_2, window_bounds = array<i64: 1, 1, 128>}]} {
    %c0 = arith.constant 0 : index
    %c0_0 = arith.constant 0 : index
    %0 = vector.load %arg1[%c0, %c0_0] : memref<8x32xf32, #tpu.memory_space<vmem>>, vector<8x32xf32>
    %cst = arith.constant 2.500000e-01 : f32
    %1 = vector.broadcast %cst : f32 to vector<8x32xf32>
    %2 = arith.mulf %0, %1 : vector<8x32xf32>
    %c0_1 = arith.constant 0 : index
    %c0_2 = arith.constant 0 : index
    %3 = vector.load %arg2[%c0_1, %c0_2] : memref<8x32xf32, #tpu.memory_space<vmem>>, vector<8x32xf32>
    %cst_3 = arith.constant 2.500000e-01 : f32
    %4 = vector.broadcast %cst_3 : f32 to vector<8x32xf32>
    %5 = arith.mulf %3, %4 : vector<8x32xf32>
    %cst_4 = arith.constant dense<0xFF800000> : vector<8xf32>
    %6 = vector.multi_reduction <maximumf>, %2, %cst_4 [1] : vector<8x32xf32> to vector<8xf32>
    %7 = vector.shape_cast %6 : vector<8xf32> to vector<8x1xf32>
    %cst_5 = arith.constant dense<0xFF800000> : vector<8xf32>
    %8 = vector.multi_reduction <maximumf>, %5, %cst_5 [1] : vector<8x32xf32> to vector<8xf32>
    %9 = vector.shape_cast %8 : vector<8xf32> to vector<8x1xf32>
    %10 = vector.broadcast %7 : vector<8x1xf32> to vector<8x32xf32>
    %11 = arith.subf %2, %10 : vector<8x32xf32>
    %12 = vector.broadcast %9 : vector<8x1xf32> to vector<8x32xf32>
    %13 = arith.subf %5, %12 : vector<8x32xf32>
    %14 = math.exp %11 : vector<8x32xf32>
    %15 = math.exp %13 : vector<8x32xf32>
    %cst_6 = arith.constant dense<0.000000e+00> : vector<8xf32>
    %16 = vector.multi_reduction <add>, %14, %cst_6 [1] : vector<8x32xf32> to vector<8xf32>
    %17 = vector.shape_cast %16 : vector<8xf32> to vector<8x1xf32>
    %cst_7 = arith.constant dense<0.000000e+00> : vector<8xf32>
    %18 = vector.multi_reduction <add>, %15, %cst_7 [1] : vector<8x32xf32> to vector<8xf32>
    %19 = vector.shape_cast %18 : vector<8xf32> to vector<8x1xf32>
    %20 = arith.subf %13, %11 : vector<8x32xf32>
    %21 = arith.mulf %15, %20 : vector<8x32xf32>
    %cst_8 = arith.constant dense<0.000000e+00> : vector<8xf32>
    %22 = vector.multi_reduction <add>, %21, %cst_8 [1] : vector<8x32xf32> to vector<8xf32>
    %23 = vector.shape_cast %22 : vector<8xf32> to vector<8x1xf32>
    %24 = arith.divf %23, %19 : vector<8x1xf32>
    %25 = math.log %19 : vector<8x1xf32>
    %26 = math.log %17 : vector<8x1xf32>
    %27 = arith.subf %25, %26 : vector<8x1xf32>
    %28 = arith.subf %24, %27 : vector<8x1xf32>
    %29 = vector.shape_cast %28 : vector<8x1xf32> to vector<1x8x1xf32>
    %cst_9 = arith.constant dense<0.000000e+00> : vector<1xf32>
    %30 = vector.multi_reduction <add>, %29, %cst_9 [1, 2] : vector<1x8x1xf32> to vector<1xf32>
    %31 = vector.shape_cast %30 : vector<1xf32> to vector<1x1x1xf32>
    %32 = vector.extract %31[0, 0, 0] : f32 from vector<1x1x1xf32>
    %33 = vector.broadcast %32 : f32 to vector<1x1x128xf32>
    %c0_10 = arith.constant 0 : index
    %c0_11 = arith.constant 0 : index
    %c0_12 = arith.constant 0 : index
    %34 = vector.load %arg3[%c0_10, %c0_11, %c0_12] : memref<1x1x128xf32, #tpu.memory_space<vmem>>, vector<1x1x128xf32>
    tpu.vector_store %arg3[%c0_10, %c0_11, %c0_12], %33 {strides = array<i32>} : memref<1x1x128xf32, #tpu.memory_space<vmem>>, vector<1x1x128xf32>,
    return
  }
  func.func @transform_0(%arg0: i32) -> (i32, i32) {
    %c0_i32 = arith.constant 0 : i32
    %c0_i32_0 = arith.constant 0 : i32
    return %arg0, %c0_i32 : i32, i32
  }
  func.func @transform_1(%arg0: i32) -> (i32, i32) {
    %c0_i32 = arith.constant 0 : i32
    %c0_i32_0 = arith.constant 0 : i32
    return %arg0, %c0_i32 : i32, i32
  }
  func.func @transform_2(%arg0: i32) -> (i32, i32, i32) {
    %c0_i32 = arith.constant 0 : i32
    %c0_i32_0 = arith.constant 0 : i32
    %c0_i32_1 = arith.constant 0 : i32
    return %arg0, %c0_i32, %c0_i32_0 : i32, i32, i32
  }
}

</mosaic_0001>

<bundles_post_ra>
// kernel: tpu_custom_call.1
= control target key start
LH: loop header
LB: loop body
LE: loop exit
PB: predicated region body
PF: predicated region fallthrough
CT: control target
= control target key end

     0   :  { %7 = vsyncpa [#allocation3], 0  ;;  %s247_s0 = inlined_call_operand.hbm [shape: f32[8,32], index: 0, kind: input, shape index: {}]   ;;  %s248_s1 = inlined_call_operand.hbm [shape: f32[8,32], index: 1, kind: input, shape index: {}]   ;;  %s249_s2 = inlined_call_operand.hbm [shape: f32[1,1,128], index: 2, kind: output, shape index: {}]  }
   0x1   :  { %8 = vsyncpa [#allocation6], 0 }
   0x2   :  { %9 = vsyncpa [#allocation4], 0  ;;  %s188_s9 = smov [#allocation2]   ;;  %s189_s11 = smov [#allocation5]  }
   0x3   :  { %s16_s10 = sshll.u32 %s188_s9, 4  ;;  %s26_s12 = sshll.u32 %s189_s11, 4  ;;  %s17_s10 = int_to_ptr.vmem [resolvable:$true] %s16_s10  ;;  %s27_s12 = int_to_ptr.vmem [resolvable:$true] %s26_s12 }
   0x4   :  { %s116_s15 = scalar_lea.hbm %s247_s0, 128 }
   0x5   :  { %p117_p0 = scmp.ne.s32.totalorder %s247_s0, %s116_s15  ;;  %p120_p1 = scmp.lt.u32.totalorder %s116_s15, %s247_s0 }
   0x7   :  { %p122_p2 = pnand %p120_p1, %p117_p0 }
   0x9   :  { %125 = shalt.err (!%p122_p2)
}
   0xa   :  { %s126_s20 = scalar_lea.vmem %s17_s10, 128  ;;  %p131_p4 = scmp.lt.s32.totalorder %s17_s10, %s17_s10 }
   0xb   :  { %p127_p3 = scmp.ne.s32.totalorder %s17_s10, %s126_s20  ;;  %p132_p5 = scmp.lt.s32.totalorder %s126_s20, %s126_s20 }
   0xd   :  { %p133_p6 = por %p132_p5, %p131_p4 }
   0xf   :  { %p134_p7 = pnand %p133_p6, %p127_p3 }
  0x11   :  { %137 = shalt.err (!%p134_p7)
}
  0x12   :  { %19 = dma.hbm_to_vmem [thread:$0]  %s247_s0, 128, %s17_s10, [#allocation3]  }
  0x13   :  { %s138_s25 = scalar_lea.hbm %s248_s1, 128 }
  0x14   :  { %p139_p8 = scmp.ne.s32.totalorder %s248_s1, %s138_s25  ;;  %p142_p9 = scmp.lt.u32.totalorder %s138_s25, %s248_s1 }
  0x16   :  { %p144_p10 = pnand %p142_p9, %p139_p8 }
  0x18   :  { %147 = shalt.err (!%p144_p10)
}
  0x19   :  { %s148_s30 = scalar_lea.vmem %s27_s12, 128  ;;  %p153_p12 = scmp.lt.s32.totalorder %s27_s12, %s27_s12 }
  0x1a   :  { %p149_p11 = scmp.ne.s32.totalorder %s27_s12, %s148_s30  ;;  %p154_p13 = scmp.lt.s32.totalorder %s148_s30, %s148_s30 }
  0x1c   :  { %p155_p0 = por %p154_p13, %p153_p12 }
  0x1e   :  { %p156_p1 = pnand %p155_p0, %p149_p11 }
  0x20   :  { %159 = shalt.err (!%p156_p1)
}
  0x21   :  { %29 = dma.hbm_to_vmem [thread:$0]  %s248_s1, 128, %s27_s12, [#allocation6]  }
  0x22   :  { %182 = dma.done.wait [#allocation3], 128  }
  0x23   :  { %183 = vsyncadd [#allocation3], 4294967168 }
  0x24   :  { %184 = dma.done.wait [#allocation6], 128  }
  0x25   :  { %185 = vsyncadd [#allocation6], 4294967168  ;;  %v36_v0 = vld [vmem:[#allocation2] sm:$0xff]  ;;  %vm40_vm0 = vcmask 261120   ;;  %v38_v1 = vld [vmem:[#allocation5] sm:$0xff]  ;;  %vm72_vm1 = vcmask 7168  }
  0x26   :  { %v37_v2 = vmul.f32 0.25, %v36_v0  ;;  %v39_v3 = vmul.f32 0.25, %v38_v1  ;;  %s190_s1 = smov [#allocation7]  }
  0x27   :  { %s91_s4 = sshll.u32 %s190_s1, 4  ;;  %s92_s4 = int_to_ptr.vmem [resolvable:$true] %s91_s4 }
  0x28   :  { %v41_v4 = vsel %vm40_vm0, %v37_v2, -inf  ;;  %v44_v5 = vsel %vm40_vm0, %v39_v3, -inf  ;;  %s160_s6 = scalar_lea.vmem %s92_s4, 16  ;;  %s164_s7 = scalar_lea.vmem %s92_s4, 32 }
  0x29   :  { %42 = vmax.xlane.f32.xlu0 %v41_v4  ;;  %p161_p2 = scmp.ne.s32.totalorder %s92_s4, %s160_s6  ;;  %p165_p3 = scmp.lt.s32.totalorder %s92_s4, %s92_s4 }
  0x2a   :  { %p166_p4 = scmp.lt.s32.totalorder %s164_s7, %s160_s6 }
  0x2c   :  { %p167_p5 = por %p166_p4, %p165_p3 }
  0x2d   :  { %45 = vmax.xlane.f32.xlu0 %v44_v5 }
  0x2e   :  { %p168_p6 = pnand %p167_p5, %p161_p2 }
  0xb6   :  { %v43_v6 = vpop.xlane.xlu0 %42 }
  0xb7   :  { %v47_v7 = vsub.f32 %v37_v2, %v43_v6 }
  0xb9   :  { %v49_v8 = vmul.f32 1.442695, %v47_v7 }
  0xba   :  { %v46_v9 = vpop.xlane.xlu0 %45 }
  0xbb   :  { %106 = vpow2.f32 %v49_v8  ;;  %v48_v10 = vsub.f32 %v39_v3, %v46_v9 }
  0xbd   :  { %v51_v11 = vmul.f32 1.442695, %v48_v10  ;;  %v59_v14 = vsub.f32 %v48_v10, %v47_v7 }
  0xbf   :  { %108 = vpow2.f32 %v51_v11 }
  0xc5   :  { %v107_v12 = vpop.eup %106 }
  0xc6   :  { %v53_v13 = vsel %vm40_vm0, %v107_v12, 0.0 }
  0xc7   :  { %54 = vadd.xlane.f32.xlu1 %v53_v13 }
  0xc9   :  { %v109_v15 = vpop.eup %108 }
  0xca   :  { %v56_v16 = vsel %vm40_vm0, %v109_v15, 0.0  ;;  %v60_v17 = vmul.f32 %v109_v15, %v59_v14 }
  0xcb   :  { %57 = vadd.xlane.f32.xlu1 %v56_v16 }
  0xcc   :  { %v61_v18 = vsel %vm40_vm0, %v60_v17, 0.0 }
  0xcd   :  { %62 = vadd.xlane.f32.xlu0 %v61_v18 }
 0x154   :  { %v55_v19 = vpop.xlane.xlu1 %54 }
 0x155   :  { %110 = vlog2.f32 %v55_v19 }
 0x158   :  { %v58_v20 = vpop.xlane.xlu1 %57 }
 0x159   :  { %112 = vrcp.f32 %v58_v20 }
 0x15a   :  { %114 = vlog2.f32 %v58_v20  ;;  %v63_v26 = vpop.xlane.xlu0 %62 }
 0x15f   :  { %v111_v21 = vpop.eup %110 }
 0x160   :  { %v69_v24 = vmul.f32 0.6931472, %v111_v21 }
 0x163   :  { %v113_v22 = vpop.eup %112 }
 0x164   :  { %v115_v23 = vpop.eup %114  ;;  %v65_v27 = vmul.f32 %v113_v22, %v63_v26 }
 0x165   :  { %v67_v25 = vmul.f32 0.6931472, %v115_v23 }
 0x167   :  { %v70_v28 = vsub.f32 %v67_v25, %v69_v24 }
 0x169   :  { %v71_v29 = vsub.f32 %v65_v27, %v70_v28 }
 0x16b   :  { %v73_v30 = vsel %vm72_vm1, %v71_v29, 0.0 }
 0x16c   :  { %74 = vadd.xlane.f32.xlu1 %v73_v30 }
 0x1f9   :  { %v75_v31 = vpop.xlane.xlu1 %74 }
 0x1fa   :  { %v76_v32 = vrot.slane %v75_v31, 4 }
 0x1fc   :  { %v77_v33 = vadd.f32 %v76_v32, %v75_v31 }
 0x1fe   :  { %v78_v34 = vrot.slane %v77_v33, 2 }
 0x200   :  { %v79_v35 = vadd.f32 %v78_v34, %v77_v33 }
 0x202   :  { %v80_v36 = vrot.slane %v79_v35, 1 }
 0x204   :  { %v81_v37 = vadd.f32 %v80_v36, %v79_v35 }
 0x206   :  { %101 = vpush %v81_v37 }
 0x237   :  { %s102_s5 = spop %101 }
 0x238   :  { %v83_v38 = vstv %s102_s5 }
 0x239   :  { %84 = vst [vmem:[#allocation7] sm:$0x1] %v83_v38 }
 0x23a   :  { %171 = shalt.err (!%p168_p6)
}
 0x23b   :  { %s172_s10 = scalar_lea.hbm %s249_s2, 16 }
 0x23c   :  { %p173_p7 = scmp.ne.s32.totalorder %s249_s2, %s172_s10  ;;  %p176_p8 = scmp.lt.u32.totalorder %s172_s10, %s249_s2 }
 0x23e   :  { %p178_p9 = pnand %p176_p8, %p173_p7 }
 0x240   :  { %181 = shalt.err (!%p178_p9)
}
 0x241   :  { %94 = dma.vmem_to_hbm [thread:$0]  %s92_s4, 16, %s249_s2, [#allocation4]  }
 0x242   :  { %186 = dma.done.wait [#allocation4], 16  }
 0x243   :  { %187 = vsyncadd [#allocation4], 4294967280 }
 0x244   :  { %98 = vsyncpa [#allocation3], 1 }
 0x245   :  { %99 = vsyncpa [#allocation6], 1 }
 0x246   :  { %100 = vsyncpa [#allocation4], 1 }

</bundles_post_ra>
